<compile_context>
chip_gen: v6e
topology: v6e:2x2x1
jax: 0.10.0
libtpu: 0.0.40
codegen_flags: <defaults>
</compile_context>

<pallas_src>
import jax
import jax.numpy as jnp
from jax.experimental import pallas as pl
from jax.experimental.pallas import tpu as pltpu


def _gray_to_rgb_kernel(x_ref, o_ref):
    # x_ref: (1, TH, TW) grayscale tile; o_ref: (3, TH, TW) RGB tile.
    # Pure VPU/DMA broadcast-copy; no MXU involvement.
    o_ref[...] = jnp.broadcast_to(x_ref[...], o_ref.shape)


def _sublane_multiple(dtype) -> int:
    # Second-to-last block dim alignment: 8 for 4-byte, 16 for 2-byte, 32 for 1-byte.
    itemsize = jnp.dtype(dtype).itemsize
    return max(8, 32 // max(itemsize, 1))


def _vmem_capacity_bytes() -> int:
    # Trace-time hardware query; conservative fallback = v7x per-core VMEM.
    try:
        cap = int(pltpu.get_tpu_info().vmem_capacity_bytes)
        if cap > 0:
            return cap
    except Exception:
        pass
    return 64 * 1024 * 1024


def _lane_dense_view(H: int, W: int, dtype):
    """If W isn't 128-aligned but H*W is, return (R, C) for a lane-dense
    2-D reshape (C a multiple of 128); otherwise None."""
    total = H * W
    if W % 128 == 0 or total % 128 != 0:
        return None
    sub = _sublane_multiple(dtype)
    best_any, best_split = 128, None
    cap = min(total, 512 * 128)  # bound the trace-time divisor search
    for c in range(128, cap + 1, 128):
        if total % c == 0:
            best_any = c
            if total // c >= 2 * sub:  # keep room for >= 2 sublane tiles
                best_split = c
    c = best_split if best_split is not None else best_any
    return total // c, c


def _pick_tiles(R: int, C: int, dtype, budget_bytes: int):
    """Block dims (tr, tc) for the (1,R,C) -> (3,R,C) broadcast copy.

    Per-step working set = 2 buffers * (1 input + 3 output) blocks
                         = 8 * tr * tc * itemsize, kept under budget_bytes.
    """
    sub = _sublane_multiple(dtype)
    itemsize = jnp.dtype(dtype).itemsize

    def rows_that_fit(tc):
        return budget_bytes // (8 * tc * itemsize)

    # Lane axis: prefer full contiguous rows; split only as a last resort.
    tc = C
    if rows_that_fit(C) < min(sub, R) and C % 128 == 0:
        max_tc = (budget_bytes // (8 * sub * itemsize)) // 128 * 128
        tc = min(C, max(128, max_tc))

    # Sublane axis: as many rows as the budget allows ...
    max_tr = max(sub, rows_that_fit(tc))
    if R > sub:
        # ... but keep >= 2 grid tiles along R so both v7x TensorCores stream.
        half = -(-R // 2)                 # ceil(R/2)
        half = -(-half // sub) * sub      # round up to the sublane multiple
        target = min(max_tr, half)
    else:
        target = max_tr
    if R <= target:
        tr = R                            # full dim (always legal)
    else:
        tr = max(sub, (target // sub) * sub)
    return tr, tc


def grayscale2rgb(image: jax.Array, *, tile_h: int | None = None,
                  tile_w: int | None = None) -> jax.Array:
    """Pallas equivalent of GrayScale2RGB.forward.

    If the leading (channel) dim is 1, replicate it 3x via a tiled Pallas
    broadcast-copy kernel; otherwise return the image unchanged. The shape
    check is static, so the branch resolves at trace time (like PyTorch's
    python-level `if`).
    """
    if image.shape[0] != 1:
        return image

    _, H, W = image.shape
    dtype = image.dtype
    itemsize = jnp.dtype(dtype).itemsize

    # Lane-dense flattening (layout plumbing only; reshapes of contiguous
    # arrays are free). Skipped when the caller pins tile sizes explicitly.
    view = None
    if tile_h is None and tile_w is None:
        view = _lane_dense_view(H, W, dtype)
    if view is not None:
        R, C = view
        x = image.reshape(1, R, C)
    else:
        R, C = H, W
        x = image

    capacity = _vmem_capacity_bytes()
    budget = min(capacity // 2, 64 * 1024 * 1024)  # v5e/v6e: 64 MiB, v7x: 32 MiB
    th, tw = _pick_tiles(R, C, dtype, budget)

    # Validate user overrides against the (sublane, 128)-or-full-dim rule so
    # bad values fail with a clear error instead of a Mosaic lowering error.
    sub = _sublane_multiple(dtype)
    if tile_h is not None:
        if tile_h != R and (tile_h <= 0 or tile_h > R or tile_h % sub != 0):
            raise ValueError(
                f"tile_h={tile_h} must equal H ({R}) or be a positive "
                f"multiple of {sub} that is <= H")
        th = tile_h
    if tile_w is not None:
        if tile_w != C and (tile_w <= 0 or tile_w > C or tile_w % 128 != 0):
            raise ValueError(
                f"tile_w={tile_w} must equal W ({C}) or be a positive "
                f"multiple of 128 that is <= W")
        tw = tile_w

    # Explicit scoped-VMEM limit: double-buffered working set + headroom for
    # Mosaic internal scratch, clamped to this generation's physical VMEM.
    working_set = 8 * th * tw * itemsize
    vmem_limit = int(min(capacity,
                         max(32 * 1024 * 1024, working_set + 16 * 1024 * 1024)))

    grid = (pl.cdiv(R, th), pl.cdiv(C, tw))

    out = pl.pallas_call(
        _gray_to_rgb_kernel,
        out_shape=jax.ShapeDtypeStruct((3, R, C), dtype),
        grid_spec=pl.GridSpec(
            grid=grid,
            # Read the single source channel's (i, j) spatial tile once.
            in_specs=[pl.BlockSpec((1, th, tw), lambda i, j: (0, i, j))],
            # Write all 3 output channels of that spatial tile at once.
            out_specs=pl.BlockSpec((3, th, tw), lambda i, j: (0, i, j)),
        ),
        compiler_params=pltpu.CompilerParams(
            dimension_semantics=("parallel", "parallel"),
            vmem_limit_bytes=vmem_limit,
        ),
        cost_estimate=pl.CostEstimate(
            flops=0, transcendentals=0,
            bytes_accessed=4 * R * C * itemsize),  # 1 read + 3 writes
    )(x)

    if view is not None:
        out = out.reshape(3, H, W)
    return out


if __name__ == "__main__":
    key = jax.random.PRNGKey(0)
    k1, k2, k3, k4 = jax.random.split(key, 4)

    # Case 1: small grayscale (1, 16, 16) -> (3, 16, 16); W not 128-aligned but
    # H*W is, so the lane-dense flattening path is exercised.
    gray = jax.random.normal(k1, (1, 16, 16), dtype=jnp.float32)
    rgb = jax.block_until_ready(grayscale2rgb(gray))
    expected = jnp.tile(gray, (3, 1, 1))
    assert rgb.shape == (3, 16, 16), rgb.shape
    assert rgb.dtype == gray.dtype
    assert bool(jnp.allclose(rgb, expected)), "replication mismatch (small)"

    # Case 2: already-RGB pass-through (unchanged semantics).
    color = jax.random.normal(k2, (3, 16, 16), dtype=jnp.float32)
    out2 = jax.block_until_ready(grayscale2rgb(color))
    assert out2.shape == (3, 16, 16)
    assert bool(jnp.allclose(out2, color)), "pass-through mismatch"

    # Case 3: lane-dense W=128 with a forced multi-tile H split (3 grid steps).
    gray_big = jax.random.normal(k3, (1, 48, 128), dtype=jnp.float32)
    rgb_big = jax.block_until_ready(grayscale2rgb(gray_big, tile_h=16))
    expected_big = jnp.tile(gray_big, (3, 1, 1))
    assert rgb_big.shape == (3, 48, 128), rgb_big.shape
    assert bool(jnp.allclose(rgb_big, expected_big)), "replication mismatch (tiled)"

    # Case 4: W=96 (not 128-aligned) -> lane-dense flatten to (24, 128) with a
    # 2-tile split along the sublane axis, then reshape back.
    gray_odd = jax.random.normal(k4, (1, 32, 96), dtype=jnp.float32)
    rgb_odd = jax.block_until_ready(grayscale2rgb(gray_odd))
    expected_odd = jnp.tile(gray_odd, (3, 1, 1))
    assert rgb_odd.shape == (3, 32, 96), rgb_odd.shape
    assert bool(jnp.allclose(rgb_odd, expected_odd)), "replication mismatch (flattened)"

    print("KERNEL_OK")
</pallas_src>

<mosaic_0001>
module attributes {stable_mosaic.version = 11 : i64} {
  func.func @_gray_to_rgb_kernel(%arg0: i32, %arg1: i32, %arg2: memref<1x1x256xf32, #tpu.memory_space<vmem>>, %arg3: memref<3x1x256xf32, #tpu.memory_space<vmem>>) attributes {dimension_semantics = [#tpu.dimension_semantics<parallel>, #tpu.dimension_semantics<parallel>], iteration_bounds = array<i64: 1, 1>, scalar_prefetch = 0 : i64, scratch_operands = 0 : i64, tpu.core_type = #tpu.core_type<tc>, window_params = [{transform_indices = @transform_0, window_bounds = array<i64: 1, 1, 256>}, {transform_indices = @transform_1, window_bounds = array<i64: 3, 1, 256>}]} {
    %c0 = arith.constant 0 : index
    %c0_0 = arith.constant 0 : index
    %c0_1 = arith.constant 0 : index
    %0 = vector.load %arg2[%c0, %c0_0, %c0_1] : memref<1x1x256xf32, #tpu.memory_space<vmem>>, vector<1x1x256xf32>
    %1 = vector.shape_cast %0 : vector<1x1x256xf32> to vector<1x1x256xf32>
    %2 = vector.broadcast %1 : vector<1x1x256xf32> to vector<3x1x256xf32>
    %c0_2 = arith.constant 0 : index
    %c0_3 = arith.constant 0 : index
    %c0_4 = arith.constant 0 : index
    %3 = vector.load %arg3[%c0_2, %c0_3, %c0_4] : memref<3x1x256xf32, #tpu.memory_space<vmem>>, vector<3x1x256xf32>
    tpu.vector_store %arg3[%c0_2, %c0_3, %c0_4], %2 {strides = array<i32>} : memref<3x1x256xf32, #tpu.memory_space<vmem>>, vector<3x1x256xf32>,
    return
  }
  func.func @transform_0(%arg0: i32, %arg1: i32) -> (i32, i32, i32) {
    %c0_i32 = arith.constant 0 : i32
    %c0_i32_0 = arith.constant 0 : i32
    return %c0_i32, %arg0, %arg1 : i32, i32, i32
  }
  func.func @transform_1(%arg0: i32, %arg1: i32) -> (i32, i32, i32) {
    %c0_i32 = arith.constant 0 : i32
    %c0_i32_0 = arith.constant 0 : i32
    return %c0_i32, %arg0, %arg1 : i32, i32, i32
  }
}

</mosaic_0001>

<bundles_post_ra>
// kernel: tpu_custom_call.1
= control target key start
LH: loop header
LB: loop body
LE: loop exit
PB: predicated region body
PF: predicated region fallthrough
CT: control target
= control target key end

     0   :  { %6 = vsyncpa [#allocation3], 0  ;;  %s114_s0 = inlined_call_operand.hbm [shape: f32[1,1,256], index: 0, kind: input, shape index: {}]   ;;  %s115_s1 = inlined_call_operand.hbm [shape: f32[3,1,256], index: 1, kind: output, shape index: {}]  }
   0x1   :  { %7 = vsyncpa [#allocation4], 0  ;;  %s94_s6 = smov [#allocation2]  }
   0x2   :  { %s14_s7 = sshll.u32 %s94_s6, 4  ;;  %s15_s7 = int_to_ptr.vmem [resolvable:$true] %s14_s7 }
   0x3   :  { %s58_s8 = scalar_lea.vmem %s15_s7, 32  ;;  %p63_p1 = scmp.lt.s32.totalorder %s15_s7, %s15_s7 }
   0x4   :  { %p59_p0 = scmp.ne.s32.totalorder %s15_s7, %s58_s8  ;;  %p64_p2 = scmp.lt.s32.totalorder %s58_s8, %s58_s8 }
   0x6   :  { %p65_p3 = por %p64_p2, %p63_p1 }
   0x8   :  { %p66_p4 = pnand %p65_p3, %p59_p0 }
   0xa   :  { %69 = shalt.err (!%p66_p4)
}
   0xb   :  { %17 = dma.hbm_to_vmem [thread:$0]  %s114_s0, 32, %s15_s7, [#allocation3]  }
   0xc   :  { %90 = dma.done.wait [#allocation3], 32  }
   0xd   :  { %91 = vsyncadd [#allocation3], 4294967264  ;;  %v22_v0 = vlaneseq  ;;  %s95_s11 = smov [#allocation5]   ;;  %v21_v1 = vld [vmem:[#allocation2] sm:$0x3] }
   0xe   :  { %s34_s12 = sshll.u32 %s95_s11, 4  ;;  %s35_s12 = int_to_ptr.vmem [resolvable:$true] %s34_s12 }
   0xf   :  { %vm24_vm0 = vcmp.lt.s32.totalorder %v22_v0, 256  ;;  %s70_s13 = scalar_lea.vmem %s35_s12, 96  ;;  %p75_p6 = scmp.lt.s32.totalorder %s35_s12, %s35_s12 }
  0x10   :  { %26 = vst.msk [vmem:[#allocation5] sm:$0x3] %vm24_vm0, %v21_v1  ;;  %27 = vst.msk [vmem:[#allocation5 + $0x2] sm:$0x3] %vm24_vm0, %v21_v1  ;;  %p71_p5 = scmp.ne.s32.totalorder %s35_s12, %s70_s13  ;;  %p76_p7 = scmp.lt.s32.totalorder %s70_s13, %s70_s13 }
  0x11   :  { %28 = vst.msk [vmem:[#allocation5 + $0x4] sm:$0x3] %vm24_vm0, %v21_v1 }
  0x12   :  { %p77_p8 = por %p76_p7, %p75_p6 }
  0x14   :  { %p78_p9 = pnand %p77_p8, %p71_p5 }
  0x16   :  { %81 = shalt.err (!%p78_p9)
}
  0x17   :  { %s96_s14 = smov 32   ;;  %s97_s0 = smov 2  }
  0x18   :  { %40 = dma.vmem_to_hbm [thread:$0]  %s35_s12, 96, %s115_s1, [#allocation4], %s96_s14, %s96_s14, %s97_s0  }
  0x19   :  { %92 = dma.done.wait [#allocation4], 96  }
  0x1a   :  { %93 = vsyncadd [#allocation4], 4294967200 }
  0x1b   :  { %44 = vsyncpa [#allocation3], 1 }
  0x1c   :  { %45 = vsyncpa [#allocation4], 1 }

</bundles_post_ra>
